<compile_context>
chip_gen: v6e
topology: v6e:2x2x1
jax: 0.10.0
libtpu: 0.0.40
codegen_flags: <defaults>
</compile_context>

<pallas_src>
import jax
import jax.numpy as jnp
from jax.experimental import pallas as pl
from jax.experimental.pallas import tpu as pltpu

# --- LFQ configuration (matches the nn.Module __init__ arithmetic) ----------
DIM = 16                        # input feature dim
CODEBOOK_SIZE = 256             # power of 2
CODEBOOK_DIM = 8                # log2(codebook_size)
NUM_CODEBOOKS = 1
CODEBOOK_DIMS = CODEBOOK_DIM * NUM_CODEBOOKS
CODEBOOK_SCALE = 1.0


def lfq_kernel(x_ref, win_ref, bin_ref, wout_ref, bout_ref, bits_ref,
               q_out_ref, idx_out_ref):
    # x_ref: (bb, DIM, tn) tile -- features on sublanes, tokens on lanes.
    w_in = win_ref[...]        # (8, 16)  resident across the grid
    w_out = wout_ref[...]      # (16, 8)
    b_in = bin_ref[...]        # (8, 1)   broadcasts along lanes
    b_out = bout_ref[...]      # (16, 1)
    bits = bits_ref[...]       # (8, 1) int32, hoisted 2^(7-j) constant

    bb = x_ref.shape[0]        # static, <= 16 -> fully unrolled
    for b in range(bb):
        x = x_ref[b]                                             # (16, tn)
        # project_in: y = W_in @ x + b_in  -> (8, tn)
        y = jnp.dot(w_in, x, preferred_element_type=jnp.float32) + b_in
        pos = y > 0
        # quantize: where(y > 0, +scale, -scale)
        q = jnp.where(pos, jnp.float32(CODEBOOK_SCALE),
                      jnp.float32(-CODEBOOK_SCALE))
        # indices: sum_j (y_j > 0) * 2^(7-j), reduced over the codebook
        # (sublane) axis -> lane-dense (1, tn).
        idx_out_ref[b] = jnp.sum(jnp.where(pos, bits, jnp.int32(0)),
                                 axis=0, keepdims=True)
        # project_out: out = W_out @ q + b_out -> (16, tn), already NCHW rows.
        out = jnp.dot(w_out, q, preferred_element_type=jnp.float32) + b_out
        q_out_ref[b] = out.astype(q_out_ref.dtype)


def lfq_forward(x_nchw, w_in, b_in, w_out, b_out, *, tn_max=16384, bb_max=16):
    """Eval-mode LFQ forward. Returns (quantized NCHW, indices BHW, aux_loss)."""
    B, D, H, W = x_nchw.shape
    assert D == DIM
    N = H * W
    # NCHW -> (B, D, N): pure reshape, no transpose, no extra HBM traffic.
    x = x_nchw.reshape(B, D, N)

    # --- tiling: lane tile tn (tokens) and batch-in-block bb --------------
    tn_max = max(128, (tn_max // 128) * 128)
    tn = N if N <= tn_max else tn_max
    bb = max(1, min(B, bb_max, tn_max // max(tn, 1)))
    grid_b = -(-B // bb)
    grid_n = -(-N // tn)
    # Keep both v7x TensorCores fed: guarantee >= 2 grid steps when possible.
    if grid_b * grid_n == 1:
        if B > 1:
            bb = -(-B // 2)
            grid_b = -(-B // bb)
        elif N > 128:
            tn = min(N, max(128, ((-(-N // 2) + 127) // 128) * 128))
            grid_n = -(-N // tn)

    b_in2 = b_in.reshape(CODEBOOK_DIMS, 1).astype(jnp.float32)
    b_out2 = b_out.reshape(DIM, 1).astype(jnp.float32)
    # Module's `mask` buffer, hoisted to a resident kernel operand.
    bits = (2 ** jnp.arange(CODEBOOK_DIM - 1, -1, -1,
                            dtype=jnp.int32)).reshape(CODEBOOK_DIMS, 1)

    q_flat, idx_flat = pl.pallas_call(
        lfq_kernel,
        out_shape=(
            jax.ShapeDtypeStruct((B, DIM, N), jnp.float32),
            jax.ShapeDtypeStruct((B, 1, N), jnp.int32),
        ),
        grid_spec=pltpu.PrefetchScalarGridSpec(
            num_scalar_prefetch=0,
            grid=(grid_b, grid_n),
            in_specs=[
                pl.BlockSpec((bb, DIM, tn), lambda ib, jn: (ib, 0, jn)),     # x
                pl.BlockSpec((CODEBOOK_DIMS, DIM), lambda ib, jn: (0, 0)),   # W_in
                pl.BlockSpec((CODEBOOK_DIMS, 1), lambda ib, jn: (0, 0)),     # b_in
                pl.BlockSpec((DIM, CODEBOOK_DIMS), lambda ib, jn: (0, 0)),   # W_out
                pl.BlockSpec((DIM, 1), lambda ib, jn: (0, 0)),               # b_out
                pl.BlockSpec((CODEBOOK_DIMS, 1), lambda ib, jn: (0, 0)),     # bits
            ],
            out_specs=[
                pl.BlockSpec((bb, DIM, tn), lambda ib, jn: (ib, 0, jn)),     # quantized
                pl.BlockSpec((bb, 1, tn), lambda ib, jn: (ib, 0, jn)),       # indices
            ],
        ),
        compiler_params=pltpu.CompilerParams(
            dimension_semantics=("parallel", "parallel")),
    )(x, w_in.astype(jnp.float32), b_in2,
      w_out.astype(jnp.float32), b_out2, bits)

    quantized = q_flat.reshape(B, DIM, H, W)      # free reshape, already NCHW
    indices = idx_flat.reshape(B, H, W)           # keep_num_codebooks_dim=False
    # indices kept int32 (values fit in 8 bits); cast outside if int64 needed.
    # TODO(synk): training-mode entropy / commitment losses not implemented
    # (the module's training path with entropy_loss_weight != 0 calls exit());
    # eval mode returns the zero buffer, reproduced here exactly.
    aux_loss = jnp.float32(0.0)
    return quantized, indices, aux_loss


def _reference(x_nchw, w_in, b_in, w_out, b_out):
    """Plain-JAX reference of the eval forward for sanity checking."""
    B, D, H, W = x_nchw.shape
    x = jnp.transpose(x_nchw, (0, 2, 3, 1)).reshape(B, H * W, D)
    y = x @ w_in.T + b_in
    q = jnp.where(y > 0, CODEBOOK_SCALE, -CODEBOOK_SCALE).astype(jnp.float32)
    mask = (2 ** jnp.arange(CODEBOOK_DIM - 1, -1, -1)).astype(jnp.int32)
    idx = jnp.sum((y > 0).astype(jnp.int32) * mask, axis=-1)
    out = q @ w_out.T + b_out
    out = out.reshape(B, H, W, D).transpose(0, 3, 1, 2)
    idx = idx.reshape(B, H, W)
    return out, idx


if __name__ == "__main__":
    key = jax.random.PRNGKey(0)
    k_x, k_wi, k_bi, k_wo, k_bo, k_x3 = jax.random.split(key, 6)

    B, H, W = 2, 16, 16
    x = jax.random.normal(k_x, (B, DIM, H, W), dtype=jnp.float32)   # NCHW

    # Deterministic synthetic Linear params (PyTorch Linear: y = x W^T + b).
    w_in = jax.random.normal(k_wi, (CODEBOOK_DIMS, DIM), jnp.float32) * 0.2
    b_in = jax.random.normal(k_bi, (CODEBOOK_DIMS,), jnp.float32) * 0.05
    w_out = jax.random.normal(k_wo, (DIM, CODEBOOK_DIMS), jnp.float32) * 0.2
    b_out = jax.random.normal(k_bo, (DIM,), jnp.float32) * 0.05

    quantized, indices, aux_loss = lfq_forward(x, w_in, b_in, w_out, b_out)
    jax.block_until_ready((quantized, indices, aux_loss))

    ref_q, ref_idx = _reference(x, w_in, b_in, w_out, b_out)
    assert quantized.shape == (B, DIM, H, W)
    assert indices.shape == (B, H, W)
    assert jnp.allclose(quantized, ref_q, atol=1e-4)
    assert jnp.array_equal(indices, ref_idx)
    assert float(aux_loss) == 0.0

    # Spatially-tiled path (grid over lane tiles, bb forced to 1).
    q2, i2, _ = lfq_forward(x, w_in, b_in, w_out, b_out, tn_max=128)
    jax.block_until_ready((q2, i2))
    assert jnp.allclose(q2, ref_q, atol=1e-4)
    assert jnp.array_equal(i2, ref_idx)

    # Remainder-tile paths: non-multiple-of-128 spatial extent and ragged batch.
    B3, H3, W3 = 3, 10, 13                         # N = 130
    x3 = jax.random.normal(k_x3, (B3, DIM, H3, W3), dtype=jnp.float32)
    ref_q3, ref_idx3 = _reference(x3, w_in, b_in, w_out, b_out)
    q3, i3, _ = lfq_forward(x3, w_in, b_in, w_out, b_out)              # batch remainder
    q4, i4, _ = lfq_forward(x3, w_in, b_in, w_out, b_out, tn_max=128)  # lane remainder
    jax.block_until_ready((q3, i3, q4, i4))
    assert jnp.allclose(q3, ref_q3, atol=1e-4) and jnp.array_equal(i3, ref_idx3)
    assert jnp.allclose(q4, ref_q3, atol=1e-4) and jnp.array_equal(i4, ref_idx3)

    print("KERNEL_OK")
</pallas_src>

<mosaic_0001>
module attributes {stable_mosaic.version = 11 : i64} {
  func.func @lfq_kernel(%arg0: i32, %arg1: i32, %arg2: memref<1x16x256xf32, #tpu.memory_space<vmem>>, %arg3: memref<8x16xf32, #tpu.memory_space<vmem>>, %arg4: memref<8x1xf32, #tpu.memory_space<vmem>>, %arg5: memref<16x8xf32, #tpu.memory_space<vmem>>, %arg6: memref<16x1xf32, #tpu.memory_space<vmem>>, %arg7: memref<8x1xi32, #tpu.memory_space<vmem>>, %arg8: memref<1x16x256xf32, #tpu.memory_space<vmem>>, %arg9: memref<1x1x256xi32, #tpu.memory_space<vmem>>) attributes {dimension_semantics = [#tpu.dimension_semantics<parallel>, #tpu.dimension_semantics<parallel>], iteration_bounds = array<i64: 2, 1>, scalar_prefetch = 0 : i64, scratch_operands = 0 : i64, tpu.core_type = #tpu.core_type<tc>, window_params = [{transform_indices = @transform_0, window_bounds = array<i64: 1, 16, 256>}, {pipeline_mode = #tpu.pipeline_mode<synchronous>, transform_indices = @transform_1, window_bounds = array<i64: 8, 16>}, {pipeline_mode = #tpu.pipeline_mode<synchronous>, transform_indices = @transform_2, window_bounds = array<i64: 8, 1>}, {pipeline_mode = #tpu.pipeline_mode<synchronous>, transform_indices = @transform_3, window_bounds = array<i64: 16, 8>}, {pipeline_mode = #tpu.pipeline_mode<synchronous>, transform_indices = @transform_4, window_bounds = array<i64: 16, 1>}, {pipeline_mode = #tpu.pipeline_mode<synchronous>, transform_indices = @transform_5, window_bounds = array<i64: 8, 1>}, {transform_indices = @transform_6, window_bounds = array<i64: 1, 16, 256>}, {transform_indices = @transform_7, window_bounds = array<i64: 1, 1, 256>}]} {
    %c0 = arith.constant 0 : index
    %c0_0 = arith.constant 0 : index
    %0 = vector.load %arg3[%c0, %c0_0] : memref<8x16xf32, #tpu.memory_space<vmem>>, vector<8x16xf32>
    %c0_1 = arith.constant 0 : index
    %c0_2 = arith.constant 0 : index
    %1 = vector.load %arg5[%c0_1, %c0_2] : memref<16x8xf32, #tpu.memory_space<vmem>>, vector<16x8xf32>
    %c0_3 = arith.constant 0 : index
    %c0_4 = arith.constant 0 : index
    %2 = vector.load %arg4[%c0_3, %c0_4] : memref<8x1xf32, #tpu.memory_space<vmem>>, vector<8x1xf32>
    %c0_5 = arith.constant 0 : index
    %c0_6 = arith.constant 0 : index
    %3 = vector.load %arg6[%c0_5, %c0_6] : memref<16x1xf32, #tpu.memory_space<vmem>>, vector<16x1xf32>
    %c0_7 = arith.constant 0 : index
    %c0_8 = arith.constant 0 : index
    %4 = vector.load %arg7[%c0_7, %c0_8] : memref<8x1xi32, #tpu.memory_space<vmem>>, vector<8x1xi32>
    %c0_9 = arith.constant 0 : index
    %c0_10 = arith.constant 0 : index
    %c0_11 = arith.constant 0 : index
    %5 = vector.load %arg2[%c0_9, %c0_10, %c0_11] : memref<1x16x256xf32, #tpu.memory_space<vmem>>, vector<1x16x256xf32>
    %6 = vector.shape_cast %5 : vector<1x16x256xf32> to vector<16x256xf32>
    %cst = arith.constant dense<0.000000e+00> : vector<8x256xf32>
    %7 = tpu.matmul %0, %6, %cst {dimension_numbers = #tpu.dot_dimension_numbers<[1], [0], [0], [1], [0, 0, 1, 1], [], []>} : vector<8x16xf32>, vector<16x256xf32>, vector<8x256xf32> -> vector<8x256xf32>
    %8 = vector.broadcast %2 : vector<8x1xf32> to vector<8x256xf32>
    %9 = arith.addf %7, %8 : vector<8x256xf32>
    %cst_12 = arith.constant 0.000000e+00 : f32
    %10 = vector.broadcast %cst_12 : f32 to vector<8x256xf32>
    %11 = arith.cmpf ogt, %9, %10 : vector<8x256xf32>
    %cst_13 = arith.constant 1.000000e+00 : f32
    %cst_14 = arith.constant -1.000000e+00 : f32
    %12 = vector.broadcast %cst_13 : f32 to vector<8x256xf32>
    %13 = vector.broadcast %cst_14 : f32 to vector<8x256xf32>
    %14 = arith.select %11, %12, %13 : vector<8x256xi1>, vector<8x256xf32>
    %c0_i32 = arith.constant 0 : i32
    %15 = vector.shape_cast %4 : vector<8x1xi32> to vector<8x1xi32>
    %16 = vector.broadcast %15 : vector<8x1xi32> to vector<8x256xi32>
    %17 = vector.broadcast %c0_i32 : i32 to vector<8x256xi32>
    %18 = arith.select %11, %16, %17 : vector<8x256xi1>, vector<8x256xi32>
    %cst_15 = arith.constant dense<0> : vector<256xi32>
    %19 = vector.multi_reduction <add>, %18, %cst_15 [0] : vector<8x256xi32> to vector<256xi32>
    %20 = vector.shape_cast %19 : vector<256xi32> to vector<1x256xi32>
    %c0_16 = arith.constant 0 : index
    %c0_17 = arith.constant 0 : index
    %c0_18 = arith.constant 0 : index
    %21 = vector.load %arg9[%c0_16, %c0_17, %c0_18] : memref<1x1x256xi32, #tpu.memory_space<vmem>>, vector<1x1x256xi32>
    %22 = vector.shape_cast %21 : vector<1x1x256xi32> to vector<1x256xi32>
    %23 = vector.shape_cast %20 : vector<1x256xi32> to vector<1x1x256xi32>
    tpu.vector_store %arg9[%c0_16, %c0_17, %c0_18], %23 {strides = array<i32>} : memref<1x1x256xi32, #tpu.memory_space<vmem>>, vector<1x1x256xi32>,
    %cst_19 = arith.constant dense<0.000000e+00> : vector<16x256xf32>
    %24 = tpu.matmul %1, %14, %cst_19 {dimension_numbers = #tpu.dot_dimension_numbers<[1], [0], [0], [1], [0, 0, 1, 1], [], []>} : vector<16x8xf32>, vector<8x256xf32>, vector<16x256xf32> -> vector<16x256xf32>
    %25 = vector.broadcast %3 : vector<16x1xf32> to vector<16x256xf32>
    %26 = arith.addf %24, %25 : vector<16x256xf32>
    %c0_20 = arith.constant 0 : index
    %c0_21 = arith.constant 0 : index
    %c0_22 = arith.constant 0 : index
    %27 = vector.load %arg8[%c0_20, %c0_21, %c0_22] : memref<1x16x256xf32, #tpu.memory_space<vmem>>, vector<1x16x256xf32>
    %28 = vector.shape_cast %27 : vector<1x16x256xf32> to vector<16x256xf32>
    %29 = vector.shape_cast %26 : vector<16x256xf32> to vector<1x16x256xf32>
    tpu.vector_store %arg8[%c0_20, %c0_21, %c0_22], %29 {strides = array<i32>} : memref<1x16x256xf32, #tpu.memory_space<vmem>>, vector<1x16x256xf32>,
    return
  }
  func.func @transform_0(%arg0: i32, %arg1: i32) -> (i32, i32, i32) {
    %c0_i32 = arith.constant 0 : i32
    %c0_i32_0 = arith.constant 0 : i32
    return %arg0, %c0_i32, %arg1 : i32, i32, i32
  }
  func.func @transform_1(%arg0: i32, %arg1: i32) -> (i32, i32) {
    %c0_i32 = arith.constant 0 : i32
    %c0_i32_0 = arith.constant 0 : i32
    %c0_i32_1 = arith.constant 0 : i32
    return %c0_i32, %c0_i32_0 : i32, i32
  }
  func.func @transform_2(%arg0: i32, %arg1: i32) -> (i32, i32) {
    %c0_i32 = arith.constant 0 : i32
    %c0_i32_0 = arith.constant 0 : i32
    %c0_i32_1 = arith.constant 0 : i32
    return %c0_i32, %c0_i32_0 : i32, i32
  }
  func.func @transform_3(%arg0: i32, %arg1: i32) -> (i32, i32) {
    %c0_i32 = arith.constant 0 : i32
    %c0_i32_0 = arith.constant 0 : i32
    %c0_i32_1 = arith.constant 0 : i32
    return %c0_i32, %c0_i32_0 : i32, i32
  }
  func.func @transform_4(%arg0: i32, %arg1: i32) -> (i32, i32) {
    %c0_i32 = arith.constant 0 : i32
    %c0_i32_0 = arith.constant 0 : i32
    %c0_i32_1 = arith.constant 0 : i32
    return %c0_i32, %c0_i32_0 : i32, i32
  }
  func.func @transform_5(%arg0: i32, %arg1: i32) -> (i32, i32) {
    %c0_i32 = arith.constant 0 : i32
    %c0_i32_0 = arith.constant 0 : i32
    %c0_i32_1 = arith.constant 0 : i32
    return %c0_i32, %c0_i32_0 : i32, i32
  }
  func.func @transform_6(%arg0: i32, %arg1: i32) -> (i32, i32, i32) {
    %c0_i32 = arith.constant 0 : i32
    %c0_i32_0 = arith.constant 0 : i32
    return %arg0, %c0_i32, %arg1 : i32, i32, i32
  }
  func.func @transform_7(%arg0: i32, %arg1: i32) -> (i32, i32, i32) {
    %c0_i32 = arith.constant 0 : i32
    %c0_i32_0 = arith.constant 0 : i32
    return %arg0, %c0_i32, %arg1 : i32, i32, i32
  }
}

</mosaic_0001>

<bundles_post_ra>
// kernel: tpu_custom_call.1
= control target key start
LH: loop header
LB: loop body
LE: loop exit
PB: predicated region body
PF: predicated region fallthrough
CT: control target
= control target key end

     0   :  { %13 = vsyncpa [#allocation3], 0  ;;  %s1204_s0 = inlined_call_operand.hbm [shape: f32[2,16,256], index: 0, kind: input, shape index: {}]   ;;  %s1205_s1 = inlined_call_operand.vmem [shape: f32[8,16], index: 1, kind: input, shape index: {}]   ;;  %s1206_s2 = inlined_call_operand.vmem [shape: f32[8,1], index: 2, kind: input, shape index: {}]   ;;  %s1207_s3 = inlined_call_operand.vmem [shape: f32[16,8], index: 3, kind: input, shape index: {}]   ;;  %s1208_s4 = inlined_call_operand.vmem [shape: f32[16,1], index: 4, kind: input, shape index: {}]   ;;  %s1209_s5 = inlined_call_operand.vmem [shape: s32[8,1], index: 5, kind: input, shape index: {}]   ;;  %s1210_s6 = inlined_call_operand.hbm [shape: f32[2,16,256], index: 6, kind: output, shape index: {0}]   ;;  %s1211_s7 = inlined_call_operand.hbm [shape: s32[2,1,256], index: 7, kind: output, shape index: {1}]  }
   0x1   :  { %15 = vsyncpa [#allocation3 + $0x1], 0 }
   0x2   :  { %16 = vsyncpa [#allocation4], 0 }
   0x3   :  { %18 = vsyncpa [#allocation4 + $0x1], 0 }
   0x4   :  { %19 = vsyncpa [#allocation7], 0 }
   0x5   :  { %21 = vsyncpa [#allocation7 + $0x1], 0  ;;  %s1013_s24 = smov 0   ;;  %s1015_s25 = smov 0  }
   0x6   :  { %s1017_s26 = smov 0   ;;  %s1019_s27 = smov 0  }
   0x7   :  { %s1021_s28 = smov 0   ;;  %s1023_s29 = smov 0  }
   0x8 LB: > { %s720_s30 = sadd.s32 4294967295, %s960_s29   ;;  %s721_s8 = sadd.s32 4294967294, %s960_s29   ;;  %s960_s29 = sphi %s1023_s29, %s27_s29   ;;  %s956_s28 = sphi %s1021_s28, %s1227_s28   ;;  %s952_s27 = sphi %s1019_s27, %s1226_s27   ;;  %s948_s26 = sphi %s1017_s26, %s1225_s26   ;;  %s944_s25 = sphi %s1015_s25, %s1224_s25   ;;  %s940_s24 = sphi %s1013_s24, %s1223_s24  }
   0x9   : > { %s39_s9 = sadd.s32 1, %s956_s28  ;;  %s48_s10 = sadd.s32 1, %s948_s26 }
   0xa   : > { %p41_p0 = scmp.ge.s32.totalorder %s39_s9, 2  ;;  %p55_p1 = scmp.ne.s32.totalorder %s948_s26, %s944_s25 }
   0xb   : > { %p56_p2 = scmp.eq.s32.totalorder %s960_s29, 0  ;;  %p61_p3 = scmp.ne.s32.totalorder %s944_s25, %s940_s24 }
   0xc   : > { %s1229_s9 = smov (%p41_p0, %s39_s9), 0  ;;  %p62_p5 = scmp.eq.s32.totalorder %s720_s30, 0 }
   0xd   : > { %1214 = sst [smem:[#allocation11_spill]] %s1229_s9  ;;  %p1054_p4 = por %p56_p2, %p55_p1 }
   0xe   : > { %s43_s12 = ssub.s32 %s956_s28, %s1229_s9  ;;  %p192_p6 = scmp.eq.s32.totalorder %s720_s30, 1 }
   0xf   : > { %p46_p7 = scmp.eq.s32.totalorder %s43_s12, 0  ;;  %p1060_p8 = por %p62_p5, %p61_p3 }
  0x10   : > { %p1064_p9 = por %p192_p6, %p55_p1  ;;  %p198_p10 = scmp.eq.s32.totalorder %s721_s8, 1 }
  0x11   : > { %s1069_s15 = scalar_select %p46_p7, %s948_s26, %s48_s10  }
  0x12   : > { %p1071_p11 = por %p198_p10, %p61_p3  ;;  %p762_p13 = scmp.lt.s32.totalorder %s960_s29, 2 }
  0x13   : > { %s261_s17 = sand.u32 1, %s948_s26   ;;  %s742_s19 = sshll.u32 %s956_s28, 9 }
  0x14   : > { %s724_s18 = sshll.u32 %s261_s17, 5  ;;  %s273_s22 = scalar_lea.hbm %s1204_s0, %s742_s19 }
  0x15   : > { %s265_s23 = scalar_lea.vmem [#allocation2], %s724_s18  ;;  %p1084_p0 = pnand %p762_p13, %p1054_p4 }
  0x16   : > { %s274_s30 = sshll.u32 %s265_s23, 4  ;;  %p727_p1 = scmp.ge.s32.totalorder %s960_s29, 1  ;;  %s275_s30 = int_to_ptr.vmem [resolvable:$true] %s274_s30 }
  0x17   : > { %s262_s10 = scalar_lea.sflag [#allocation3], %s261_s17  ;;  %p824_p2 = pneg %p1084_p0 }
  0x18   : > { %s835_s12 = scalar_lea.vmem %s275_s30, 512  ;;  %s962_s9 = smov [#allocation2]  }
  0x19   : > { %p836_p3 = scmp.ne.s32.totalorder %s275_s30, %s835_s12  ;;  %s840_s20 = sshll.u32 %s962_s9, 4  ;;  %s841_s20 = int_to_ptr.vmem [resolvable:$false] %s840_s20 }
  0x1a   : > { %s842_s18 = scalar_lea.vmem %s841_s20, 1024  ;;  %p843_p7 = scmp.lt.s32.totalorder %s275_s30, %s841_s20 }
  0x1b   : > { %p838_p5 = pnand %p836_p3, %p824_p2  ;;  %p844_p10 = scmp.lt.s32.totalorder %s842_s18, %s835_s12 }
  0x1d   : > { %p839_p6 = pneg %p838_p5  ;;  %p845_p12 = por %p844_p10, %p843_p7 }
  0x1f   : > { %p846_p4 = pnand %p845_p12, %p839_p6 }
  0x21   : > { %849 = shalt.err (!%p846_p4)
}
  0x22   : > { %s963_s11 = smov 256   ;;  %s964_s17 = smov 16  }
  0x23   : > { %754 = dma.hbm_to_vmem [thread:$0]  (!%p1084_p0), %s273_s22, 512, %s275_s30, %s262_s10, %s963_s11, %s963_s11, %s964_s17  }
  0x24   : > { %p282_p13 = scmp.lt.s32.totalorder %s960_s29, 3 }
  0x26   : > { %p283_p2 = pnand %p727_p1, %p282_p13 }
  0x27   : > { %s1097_s9 = sand.u32 (!%p283_p2), 1, %s944_s25  }
  0x28   : > { %286 = sbr.rel (%p283_p2) target bundleno = 469 (0x1d5), region = 44  ;;  %s1213_s19 = sshll.u32 (!%p283_p2), %s1097_s9, 5 }
  0x29   : > { %s289_s21 = scalar_lea.sflag (!%p283_p2), [#allocation3], %s1097_s9  ;;  %s292_s23 = scalar_lea.vmem (!%p283_p2), [#allocation2], %s1213_s19 }
  0x2d   : > { %927 = dma.done.wait (%p1060_p8), %s289_s21, 512  }
  0x2e   : > { %929 = vsyncadd (%p1060_p8), %s289_s21, 4294966784  ;;  %v965_v0 = vmov 0.0   ;;  %v966_v1 = vmov 0   ;;  %v341_v2 = vld [vmem:[%s292_s23 + $0x18] sm:$0xff]  ;;  %v340_v3 = vld [vmem:[%s292_s23 + $0x10] sm:$0xff]  ;;  %vm347_vm0 = vcmask 130048   ;;  %v447_v30 = vlaneseq }
  0x2f   : > { %415 = vmatprep.mubr.f32.mxu0 %v965_v0  ;;  %820 = vset.pattern.permute.xlu0 %v966_v1  ;;  %v339_v4 = vld [vmem:[%s292_s23 + $0x8] sm:$0xff]  ;;  %v338_v5 = vld [vmem:[%s292_s23] sm:$0xff]  ;;  %v967_v19 = vmov -1.0   ;;  %vm473_vm3 = vcmask 64512   ;;  %v968_v28 = vmov 1966171168  }
  0x30   : > { %544 = vmatprep.mubr.f32.mxu1 %v965_v0  ;;  %821 = vset.pattern.permute.xlu1 %v966_v1  ;;  %v334_v6 = vld [vmem:[%s1206_s2] sm:$0xff]  ;;  %v336_v10 = vld [vmem:[%s1208_s4 + $0x8] sm:$0xff]  ;;  %v445_v29 = vunpack.c.l.s4 %v968_v28  ;;  %v448_v37 = vshrl.u32 %v447_v30, 7  ;;  %s730_s8 = sshll.u32 %s1097_s9, 1  ;;  %vm460_vm4 = vcmp.lt.s32.totalorder %v447_v30, 256  ;;  %s744_s13 = sshll.u32 %s952_s27, 5 }
  0x31   : > { %379 = vmatprep.subr.mxu0 %v341_v2  ;;  %v331_v7 = vld [vmem:[%s1205_s1] sm:$0xff]  ;;  %344 = vperm.xlu0 %820, %v334_v6   ;;  %v333_v31 = vld [vmem:[%s1207_s3 + $0x8] sm:$0xff]  ;;  %s327_s10 = scalar_lea.vmem [#allocation6], %s730_s8  ;;  %s599_s18 = scalar_lea.hbm %s1211_s7, %s744_s13 }
  0x32   : > { %380 = vmatpush1.msra.mxu0 %v340_v3  ;;  %v337_v8 = vld [vmem:[%s1209_s5] sm:$0xff]  ;;  %v446_v36 = vunpack.c.0.s8 %v445_v29  ;;  %s601_s11 = sshll.u32 %s327_s10, 4  ;;  %s567_s17 = scalar_lea.sflag [#allocation7], %s1097_s9  ;;  %s602_s11 = int_to_ptr.vmem [resolvable:$true] %s601_s11 }
  0x33   : > { %381 = vmatprep.subr.mxu0 %v339_v4  ;;  %v335_v9 = vld [vmem:[%s1208_s4] sm:$0xff]  ;;  %s850_s21 = scalar_lea.vmem %s602_s11, 32  ;;  %s969_s23 = smov [#allocation6]  }
  0x34   : > { %382 = vmatpush1.msra.mxu0 %v338_v5  ;;  %465 = vperm.xlu1 %821, %v335_v9   ;;  %v332_v22 = vld [vmem:[%s1207_s3] sm:$0xff]  ;;  %v449_v41 = vsub.s32 %v446_v36, %v448_v37  ;;  %p851_p8 = scmp.ne.s32.totalorder %s602_s11, %s850_s21  ;;  %s854_s22 = sshll.u32 %s969_s23, 4  ;;  %s855_s22 = int_to_ptr.vmem [resolvable:$false] %s854_s22 }
  0x35   : > { %731 = vmatmul.mubr.msk.f32.vlgmr.msra.gmra.mxu0 %vm347_vm0, %v331_v7  ;;  %427 = vperm.xlu0 %820, %v337_v8   ;;  %s856_s30 = scalar_lea.vmem %s855_s22, 64  ;;  %p857_p1 = scmp.lt.s32.totalorder %s602_s11, %s855_s22 }
  0x36   : > { %p852_p12 = pnand %p851_p8, %p1064_p9  ;;  %p858_p3 = scmp.lt.s32.totalorder %s856_s30, %s850_s21 }
  0x38   : > { %470 = vperm.xlu1 %821, %v336_v10   ;;  %p853_p0 = pneg %p852_p12  ;;  %p859_p5 = por %p858_p3, %p857_p1 }
  0x3a   : > { %p860_p6 = pnand %p859_p5, %p853_p0 }
  0xac   : > { %v345_v11 = vpop.permute.xlu0 %344 }
  0xb0   : > { %v428_v14 = vpop.permute.xlu0 %427 }
  0xf5   : > { %v417_v12 = vpop.f32.mrf.mxu0 }
  0xf6   : > { %v418_v13 = vadd.f32 %v417_v12, %v345_v11 }
  0xf7   : > { %v419_v15 = vpop.f32.mrf.mxu0 }
  0xf8   : > { %vm422_vm1 = vcmp.gt.f32.partialorder %v418_v13, 0.0  ;;  %v420_v16 = vadd.f32 %v419_v15, %v345_v11 }
  0xf9   : > { %v429_v17 = vsel %vm422_vm1, %v428_v14, 0  ;;  %v424_v25 = vsel %vm422_vm1, 1.0, %v967_v19 }
  0xfa   : > { %v431_v18 = vrot.slane %v429_v17, 4  ;;  %vm423_vm2 = vcmp.gt.f32.partialorder %v420_v16, 0.0 }
  0xfb   : > { %v425_v20 = vsel %vm423_vm2, 1.0, %v967_v19  ;;  %v430_v21 = vsel %vm423_vm2, %v428_v14, 0 }
  0xfc   : > { %v432_v23 = vadd.s32 %v431_v18, %v429_v17  ;;  %v437_v24 = vrot.slane %v430_v21, 4  ;;  %510 = vmatprep.subr.mxu1 %v425_v20 }
  0xfd   : > { %511 = vmatpush1.msra.mxu1 %v424_v25 }
  0xfe   : > { %v433_v26 = vrot.slane %v432_v23, 2  ;;  %v438_v27 = vadd.s32 %v437_v24, %v430_v21  ;;  %732 = vmatmul.mubr.msk.f32.vlgmr.msra.gmra.mxu1 %vm473_vm3, %v332_v22 }
  0xff   : > { %550 = vmatprep.mubr.f32.mxu1 %v965_v0 }
 0x100   : > { %v434_v32 = vadd.s32 %v433_v26, %v432_v23  ;;  %v439_v33 = vrot.slane %v438_v27, 2 }
 0x102   : > { %v435_v34 = vrot.slane %v434_v32, 1  ;;  %v440_v35 = vadd.s32 %v439_v33, %v438_v27  ;;  %733 = vmatmul.mubr.msk.f32.gmra.mxu1 %vm473_vm3, %v333_v31 }
 0x104   : > { %v441_v38 = vrot.slane %v440_v35, 1  ;;  %v436_v39 = vadd.s32 %v435_v34, %v434_v32 }
 0x106   : > { %v442_v40 = vadd.s32 %v441_v38, %v440_v35 }
 0x108   : > { %v443_v42 = vcombine.low %v436_v39, %v442_v40 }
 0x10a   : > { %v450_v43 = vrot.slane %v443_v42, %v449_v41 }
 0x10c   : > { %v457_v44 = vrot.slane %v450_v43, %v449_v41 }
 0x10e   : > { %462 = vst.msk [vmem:[%s327_s10] sm:$0x3] %vm460_vm4, %v457_v44 }
 0x10f   : > { %863 = shalt.err (!%p860_p6)
}
 0x110   : > { %s864_s8 = scalar_lea.hbm %s599_s18, 32  ;;  %s868_s12 = scalar_lea.hbm %s1211_s7, 64 }
 0x111   : > { %p865_p7 = scmp.ne.s32.totalorder %s599_s18, %s864_s8  ;;  %p869_p13 = scmp.lt.s32.totalorder %s599_s18, %s1211_s7 }
 0x112   : > { %p870_p2 = scmp.lt.s32.totalorder %s868_s12, %s864_s8 }
 0x113   : > { %p866_p10 = pnand %p865_p7, %p1064_p9 }
 0x114   : > { %p871_p8 = por %p870_p2, %p869_p13 }
 0x115   : > { %p867_p4 = pneg %p866_p10 }
 0x117   : > { %p872_p12 = pnand %p871_p8, %p867_p4 }
 0x119   : > { %875 = shalt.err (!%p872_p12)
}
 0x11a   : > { %748 = dma.vmem_to_hbm [thread:$0]  (%p1064_p9), %s602_s11, 32, %s599_s18, %s567_s17   ;;  %v466_v45 = vpop.permute.xlu1 %465 }
 0x11b   : > { %s1220_s21 = sshll.u32 %s1097_s9, 5  ;;  %s743_s19 = sshll.u32 %s952_s27, 9 }
 0x11c   : > { %s320_s23 = scalar_lea.vmem [#allocation5], %s1220_s21  ;;  %s1156_s17 = scalar_lea.hbm %s1210_s6, %s743_s19 }
 0x11d   : > { %s582_s22 = sshll.u32 %s320_s23, 4  ;;  %s562_s30 = scalar_lea.sflag [#allocation4], %s1097_s9  ;;  %s1151_s22 = int_to_ptr.vmem [resolvable:$true] %s582_s22 }
 0x11e   : > { %v471_v50 = vpop.permute.xlu1 %470  ;;  %s876_s27 = scalar_lea.vmem %s1151_s22, 512  ;;  %s970_s8 = smov [#allocation5]  }
 0x11f   : > { %p877_p0 = scmp.ne.s32.totalorder %s1151_s22, %s876_s27  ;;  %s880_s10 = sshll.u32 %s970_s8, 4  ;;  %s881_s10 = int_to_ptr.vmem [resolvable:$false] %s880_s10 }
 0x120   : > { %s882_s13 = scalar_lea.vmem %s881_s10, 1024  ;;  %p883_p5 = scmp.lt.s32.totalorder %s1151_s22, %s881_s10 }
 0x121   : > { %p878_p1 = pnand %p877_p0, %p1064_p9  ;;  %p884_p6 = scmp.lt.s32.totalorder %s882_s13, %s876_s27 }
 0x123   : > { %p879_p3 = pneg %p878_p1  ;;  %p885_p7 = por %p884_p6, %p883_p5 }
 0x125   : > { %p886_p10 = pnand %p885_p7, %p879_p3 }
 0x1be   : > { %v546_v46 = vpop.f32.mrf.mxu1 }
 0x1bf   : > { %v547_v47 = vadd.f32 %v546_v46, %v466_v45 }
 0x1c0   : > { %v548_v48 = vpop.f32.mrf.mxu1 }
 0x1c1   : > { %557 = vst [vmem:[%s320_s23] sm:$0xff] %v547_v47  ;;  %v549_v49 = vadd.f32 %v548_v48, %v466_v45 }
 0x1c2   : > { %v552_v51 = vpop.f32.mrf.mxu1 }
 0x1c3   : > { %558 = vst [vmem:[%s320_s23 + $0x8] sm:$0xff] %v549_v49  ;;  %v553_v52 = vadd.f32 %v552_v51, %v471_v50 }
 0x1c4   : > { %v554_v53 = vpop.f32.mrf.mxu1 }
 0x1c5   : > { %559 = vst [vmem:[%s320_s23 + $0x10] sm:$0xff] %v553_v52  ;;  %v555_v54 = vadd.f32 %v554_v53, %v471_v50 }
 0x1c7   : > { %560 = vst [vmem:[%s320_s23 + $0x18] sm:$0xff] %v555_v54 }
 0x1c8   : > { %889 = shalt.err (!%p886_p10)
}
 0x1c9   : > { %s890_s12 = scalar_lea.hbm %s1156_s17, 512  ;;  %s894_s23 = scalar_lea.hbm %s1210_s6, 1024 }
 0x1ca   : > { %p891_p4 = scmp.ne.s32.totalorder %s1156_s17, %s890_s12  ;;  %p895_p8 = scmp.lt.s32.totalorder %s1156_s17, %s1210_s6 }
 0x1cb   : > { %p896_p12 = scmp.lt.s32.totalorder %s894_s23, %s890_s12 }
 0x1cc   : > { %p892_p13 = pnand %p891_p4, %p1064_p9 }
 0x1cd   : > { %p897_p0 = por %p896_p12, %p895_p8 }
 0x1ce   : > { %p893_p2 = pneg %p892_p13 }
 0x1d0   : > { %p898_p1 = pnand %p897_p0, %p893_p2 }
 0x1d2   : > { %901 = shalt.err (!%p898_p1)
}
 0x1d3   : > { %s971_s11 = smov 256   ;;  %s972_s27 = smov 16  }
 0x1d4   : > { %747 = dma.vmem_to_hbm [thread:$0]  (%p1064_p9), %s1151_s22, 512, %s1156_s17, %s562_s30, %s971_s11, %s971_s11, %s972_s27  }
 0x1d5 PF: > { %s613_s8 = sand.u32 1, %s940_s24   ;;  %p1221_p3 = scmp.ge.s32.totalorder %s960_s29, 2 }
 0x1d6   : > { %s614_s10 = scalar_lea.sflag [#allocation4], %s613_s8 }
 0x1d7   : > { %p756_p5 = pnand %p1221_p3, %p1071_p11 }
 0x1d9   : > { %p757_p6 = pneg %p756_p5 }
 0x1db   : > { %931 = dma.done.wait (%p757_p6), %s614_s10, 512  }
 0x1dc   : > { %933 = vsyncadd (%p757_p6), %s614_s10, 4294966784  ;;  %s623_s13 = scalar_lea.sflag [#allocation7], %s613_s8 }
 0x1dd   : > { %935 = dma.done.wait (%p757_p6), %s623_s13, 32  }
 0x1de   : > { %937 = vsyncadd (%p757_p6), %s623_s13, 4294967264  ;;  %s27_s29 = sadd.s32 1, %s960_s29   ;;  %s1222_s14 = sld [smem:[#allocation11_spill]] }
 0x1df   : > { %p24_p7 = scmp.ge.s32.totalorder %s27_s29, 4   ;;  %s1223_s24 = smov %s944_s25 }
 0x1e0   : > { %s1224_s25 = smov %s948_s26  ;;  %s1225_s26 = smov %s1069_s15 }
 0x1e1   : > { %s1226_s27 = smov %s956_s28  ;;  %26 = sbr.rel (!%p24_p7) target bundleno = 8 (0x8), region = 106 }
 0x1e4   : > { %s1227_s28 = smov %s1222_s14 }
 0x1e6   :  { %628 = vsyncpa [#allocation3], 1 }
 0x1e7   :  { %630 = vsyncpa [#allocation3 + $0x1], 1 }
 0x1e8   :  { %631 = vsyncpa [#allocation4], 1 }
 0x1e9   :  { %633 = vsyncpa [#allocation4 + $0x1], 1 }
 0x1ea   :  { %634 = vsyncpa [#allocation7], 1 }
 0x1eb   :  { %636 = vsyncpa [#allocation7 + $0x1], 1 }

</bundles_post_ra>
